<compile_context>
chip_gen: v7x
topology: tpu7x:2x2x1
jax: 0.10.0
libtpu: 0.0.40
codegen_flags: <defaults>
</compile_context>

<pallas_src>
import functools

import jax
import jax.numpy as jnp
import numpy as np
from jax.experimental import pallas as pl
from jax.experimental.pallas import tpu as pltpu


def _round_up(x, m):
    return (x + m - 1) // m * m


def gvp_kernel(s_ref, v_ref, wvec_ref, wss_ref, wsh_ref, b_ref,
               s_out_ref, v_out_ref, *, hidden, cv_out):
    """One row-tile of the GVP forward pass.

    s_ref     : (T, Cs_in)               compute dtype
    v_ref     : (T, 3*Cv_in)             rows are [v_x | v_y | v_z]
    wvec_ref  : (3*Cv_in, 3*Cv_out+3*H)  [kron(I3, Wp@Wq) | kron(I3, Wp)]
    wss_ref   : (Cs_in, Cs_out)          compute dtype
    wsh_ref   : (H, Cs_out)              f32 (tiny; kept full precision)
    b_ref     : (1, Cs_out)              f32
    s_out_ref : (T, Cs_out)
    v_out_ref : (T, 3*Cv_out)
    """
    co3 = 3 * cv_out

    # Single fused MXU pass.  Column order puts the "pred" block at lane 0 so
    # the gated vector output is one contiguous, lane-aligned slab.
    fused = jnp.dot(v_ref[...], wvec_ref[...],
                    preferred_element_type=jnp.float32)        # (T, 3Co+3H) f32

    pred = fused[:, :co3]                                       # (T, 3*Co)
    px = pred[:, 0 * cv_out:1 * cv_out]
    py = pred[:, 1 * cv_out:2 * cv_out]
    pz = pred[:, 2 * cv_out:3 * cv_out]
    # Note: no epsilon inside sqrt -- matches the PyTorch forward exactly.
    pred_norm = jnp.sqrt(px * px + py * py + pz * pz)           # (T, Co) f32

    vpx = fused[:, co3 + 0 * hidden:co3 + 1 * hidden]
    vpy = fused[:, co3 + 1 * hidden:co3 + 2 * hidden]
    vpz = fused[:, co3 + 2 * hidden:co3 + 3 * hidden]
    proj_norm = jnp.sqrt(vpx * vpx + vpy * vpy + vpz * vpz)     # (T, H) f32

    # project_scalars on cat(scalars, proj_norm) with the weight pre-split.
    # The proj_norm branch stays f32 end-to-end (negligible MXU cost).
    sp = (jnp.dot(s_ref[...], wss_ref[...],
                  preferred_element_type=jnp.float32)
          + jnp.dot(proj_norm, wsh_ref[...],
                    preferred_element_type=jnp.float32)
          + b_ref[...])                                         # (T, Cs_out) f32
    s_out_ref[...] = jnp.maximum(sp, 0.0).astype(s_out_ref.dtype)

    # Vector activation: sigmoid gate (f32, EUP), ONE lane-contiguous store.
    gate = jax.nn.sigmoid(pred_norm)                            # (T, Co) f32
    v_out_ref[...] = (jnp.tile(gate, (1, 3)) * pred).astype(v_out_ref.dtype)


@functools.partial(jax.jit, static_argnames=("tile_n", "compute_dtype"))
def gvp_forward(scalars, vectors, params, *, tile_n=None,
                compute_dtype=jnp.bfloat16):
    """scalars: (N, Cs_in), vectors: (N, 3, Cv_in).  Returns (s_out, v_out)."""
    wp_t, wq_t, ws_s_t, ws_h_t, bias = params
    n, cs_in = scalars.shape
    _, _, cv_in = vectors.shape
    hidden = wp_t.shape[1]
    cv_out = wq_t.shape[1]
    cs_out = ws_s_t.shape[1]
    itemsize = jnp.dtype(compute_dtype).itemsize

    # ---- tiny weight prep (O(C^2), negligible vs. the N-sized streams) ----
    # Fold project->predict (f32), build block-diagonal fused weight with the
    # pred block FIRST so its lanes start at 0 inside the kernel.
    eye3 = jnp.eye(3, dtype=jnp.float32)
    wp_f32 = wp_t.astype(jnp.float32)
    wpq_f32 = wp_f32 @ wq_t.astype(jnp.float32)
    w_vec = jnp.concatenate(
        [jnp.kron(eye3, wpq_f32), jnp.kron(eye3, wp_f32)],
        axis=1).astype(compute_dtype)                     # (3*Cv_in, 3Co+3H)
    wss = ws_s_t.astype(compute_dtype)                    # (Cs_in, Cs_out)
    wsh = ws_h_t.astype(jnp.float32)                      # stays f32 (tiny)
    bias2d = bias.reshape(1, cs_out).astype(jnp.float32)

    # ---- streamed activations: free minor-dim collapse; casts are no-ops
    #      when dtypes already match; NO padding (ragged last block instead) --
    s2d = scalars if scalars.dtype == compute_dtype else scalars.astype(compute_dtype)
    v2d = vectors.reshape(n, 3 * cv_in)
    v2d = v2d if v2d.dtype == compute_dtype else v2d.astype(compute_dtype)

    # ---- row tile: large (bandwidth-bound), sublane-aligned, and clamped so
    #      the grid has >= 2 steps when possible (v7x megacore sharding) ------
    if tile_n is None:
        tile_n = 4096        # fits 48 MiB scoped VMEM on all of v5e/v6e/v7x;
                             # raise to 8192 on v5e/v6e (128 MiB VMEM) if wanted
    half = _round_up(-(-n // 2), 8)                       # ceil(n/2) -> x8
    tile = max(8, min(_round_up(tile_n, 8), half, _round_up(n, 8)))
    grid = (pl.cdiv(n, tile),)                            # ragged tail is fine:
                                                          # OOB stores are masked

    def row_spec(c):
        return pl.BlockSpec((tile, c), lambda i: (i, 0))

    def fixed_spec(r, c):                                 # VMEM-resident weights
        return pl.BlockSpec((r, c), lambda i: (0, 0))

    flops = 2 * n * (3 * cv_in * (3 * hidden + 3 * cv_out)
                     + cs_in * cs_out + hidden * cs_out)
    transcendentals = n * (hidden + 2 * cv_out)
    bytes_accessed = (itemsize * n * (cs_in + 3 * cv_in + cs_out + 3 * cv_out)
                      + itemsize * (w_vec.size + wss.size)
                      + 4 * (wsh.size + bias2d.size))

    kernel = functools.partial(gvp_kernel, hidden=hidden, cv_out=cv_out)

    s_out, v_out2d = pl.pallas_call(
        kernel,
        out_shape=(
            jax.ShapeDtypeStruct((n, cs_out), compute_dtype),
            jax.ShapeDtypeStruct((n, 3 * cv_out), compute_dtype),
        ),
        grid=grid,
        in_specs=(
            row_spec(cs_in),                              # scalars
            row_spec(3 * cv_in),                          # vectors (flattened)
            fixed_spec(3 * cv_in, 3 * cv_out + 3 * hidden),
            fixed_spec(cs_in, cs_out),                    # Ws.T (scalar part)
            fixed_spec(hidden, cs_out),                   # Ws.T (norm part, f32)
            fixed_spec(1, cs_out),                        # bias (f32)
        ),
        out_specs=(
            row_spec(cs_out),
            row_spec(3 * cv_out),
        ),
        compiler_params=pltpu.CompilerParams(
            dimension_semantics=("parallel",),            # megacore on v7x
            vmem_limit_bytes=48 * 1024 * 1024),           # <= v7x 64 MiB physical
        cost_estimate=pl.CostEstimate(
            flops=flops, transcendentals=transcendentals,
            bytes_accessed=bytes_accessed),
    )(s2d, v2d, w_vec, wss, wsh, bias2d)

    v_out = v_out2d.reshape(n, 3, cv_out)                 # free split of minor dims
    return s_out, v_out


def gvp_reference(scalars, vectors, params):
    """Pure-JAX reference mirroring the PyTorch forward exactly (f32)."""
    wp_t, wq_t, ws_s_t, ws_h_t, bias = params
    vp = jnp.einsum("nkc,ch->nkh", vectors, wp_t)          # (N,3,H)
    pred = jnp.einsum("nkh,ho->nko", vp, wq_t)             # (N,3,Cv_out)
    proj_norm = jnp.linalg.norm(vp, axis=1)                # (N,H)
    pred_norm = jnp.linalg.norm(pred, axis=1, keepdims=True)
    sp = scalars @ ws_s_t + proj_norm @ ws_h_t + bias
    return jax.nn.relu(sp), jax.nn.sigmoid(pred_norm) * pred


def init_params(key, in_scalars, in_vectors, out_scalars, out_vectors,
                hidden_vectors=None):
    hidden_vectors = hidden_vectors or max(in_vectors, out_vectors)
    k1, k2, k3, k4 = jax.random.split(key, 4)
    # nn.Linear weights are (out_features, in_features); stored transposed.
    wp = jax.random.normal(k1, (hidden_vectors, in_vectors), jnp.float32) * 0.2
    wq = jax.random.normal(k2, (out_vectors, hidden_vectors), jnp.float32) * 0.2
    ws = jax.random.normal(
        k3, (out_scalars, in_scalars + hidden_vectors), jnp.float32) * 0.2
    b = jax.random.normal(k4, (out_scalars,), jnp.float32) * 0.1
    ws_s = ws[:, :in_scalars]
    ws_h = ws[:, in_scalars:]
    return (wp.T, wq.T, ws_s.T, ws_h.T, b)


if __name__ == "__main__":
    # Small deterministic shapes; N=100 exercises the ragged last block and
    # the >=2-grid-step clamp (tile becomes 56 -> grid of 2).
    N = 100
    in_scalars, in_vectors = 16, 8
    out_scalars, out_vectors = 12, 6
    hidden_vectors = max(in_vectors, out_vectors)  # 8

    key = jax.random.PRNGKey(0)
    ks, kv, kp = jax.random.split(key, 3)
    scalars = jax.random.normal(ks, (N, in_scalars), jnp.float32)
    vectors = jax.random.normal(kv, (N, 3, in_vectors), jnp.float32)
    params = init_params(kp, in_scalars, in_vectors, out_scalars, out_vectors,
                         hidden_vectors)

    s_ref, v_ref = gvp_reference(scalars, vectors, params)

    # f32 path (tight check).
    s_out, v_out = gvp_forward(scalars, vectors, params,
                               compute_dtype=jnp.float32)
    jax.block_until_ready((s_out, v_out))
    np.testing.assert_allclose(np.asarray(s_out), np.asarray(s_ref),
                               rtol=1e-5, atol=1e-5)
    np.testing.assert_allclose(np.asarray(v_out), np.asarray(v_ref),
                               rtol=1e-5, atol=1e-5)

    # Default bf16-streaming path (halved HBM bytes); inputs passed as bf16 so
    # no extra wrapper-side cast pass.  Loose check vs. the f32 reference.
    s_bf, v_bf = gvp_forward(scalars.astype(jnp.bfloat16),
                             vectors.astype(jnp.bfloat16), params)
    jax.block_until_ready((s_bf, v_bf))
    np.testing.assert_allclose(np.asarray(s_bf, dtype=np.float32),
                               np.asarray(s_ref), rtol=6e-2, atol=6e-2)
    np.testing.assert_allclose(np.asarray(v_bf, dtype=np.float32),
                               np.asarray(v_ref), rtol=6e-2, atol=6e-2)

    print("KERNEL_OK")
</pallas_src>

<mosaic_0001>
module attributes {stable_mosaic.version = 11 : i64} {
  func.func @gvp_kernel(%arg0: i32, %arg1: memref<56x16xf32, #tpu.memory_space<vmem>>, %arg2: memref<56x24xf32, #tpu.memory_space<vmem>>, %arg3: memref<24x42xf32, #tpu.memory_space<vmem>>, %arg4: memref<16x12xf32, #tpu.memory_space<vmem>>, %arg5: memref<8x12xf32, #tpu.memory_space<vmem>>, %arg6: memref<1x12xf32, #tpu.memory_space<vmem>>, %arg7: memref<56x12xf32, #tpu.memory_space<vmem>>, %arg8: memref<56x18xf32, #tpu.memory_space<vmem>>) attributes {dimension_semantics = [#tpu.dimension_semantics<parallel>], iteration_bounds = array<i64: 2>, scalar_prefetch = 0 : i64, scratch_operands = 0 : i64, tpu.core_type = #tpu.core_type<tc>, window_params = [{transform_indices = @transform_0, window_bounds = array<i64: 56, 16>}, {transform_indices = @transform_1, window_bounds = array<i64: 56, 24>}, {pipeline_mode = #tpu.pipeline_mode<synchronous>, transform_indices = @transform_2, window_bounds = array<i64: 24, 42>}, {pipeline_mode = #tpu.pipeline_mode<synchronous>, transform_indices = @transform_3, window_bounds = array<i64: 16, 12>}, {pipeline_mode = #tpu.pipeline_mode<synchronous>, transform_indices = @transform_4, window_bounds = array<i64: 8, 12>}, {pipeline_mode = #tpu.pipeline_mode<synchronous>, transform_indices = @transform_5, window_bounds = array<i64: 1, 12>}, {transform_indices = @transform_6, window_bounds = array<i64: 56, 12>}, {transform_indices = @transform_7, window_bounds = array<i64: 56, 18>}]} {
    %c0 = arith.constant 0 : index
    %c0_0 = arith.constant 0 : index
    %0 = vector.load %arg2[%c0, %c0_0] : memref<56x24xf32, #tpu.memory_space<vmem>>, vector<56x24xf32>
    %c0_1 = arith.constant 0 : index
    %c0_2 = arith.constant 0 : index
    %1 = vector.load %arg3[%c0_1, %c0_2] : memref<24x42xf32, #tpu.memory_space<vmem>>, vector<24x42xf32>
    %cst = arith.constant dense<0.000000e+00> : vector<56x42xf32>
    %2 = tpu.matmul %0, %1, %cst {dimension_numbers = #tpu.dot_dimension_numbers<[1], [0], [0], [1], [0, 0, 1, 1], [], []>} : vector<56x24xf32>, vector<24x42xf32>, vector<56x42xf32> -> vector<56x42xf32>
    %3 = vector.extract_strided_slice %2 {offsets = [0, 0], sizes = [56, 18], strides = [1, 1]} : vector<56x42xf32> to vector<56x18xf32>
    %4 = vector.extract_strided_slice %3 {offsets = [0, 0], sizes = [56, 6], strides = [1, 1]} : vector<56x18xf32> to vector<56x6xf32>
    %5 = vector.extract_strided_slice %3 {offsets = [0, 6], sizes = [56, 6], strides = [1, 1]} : vector<56x18xf32> to vector<56x6xf32>
    %6 = vector.extract_strided_slice %3 {offsets = [0, 12], sizes = [56, 6], strides = [1, 1]} : vector<56x18xf32> to vector<56x6xf32>
    %7 = arith.mulf %4, %4 : vector<56x6xf32>
    %8 = arith.mulf %5, %5 : vector<56x6xf32>
    %9 = arith.addf %7, %8 : vector<56x6xf32>
    %10 = arith.mulf %6, %6 : vector<56x6xf32>
    %11 = arith.addf %9, %10 : vector<56x6xf32>
    %12 = math.sqrt %11 : vector<56x6xf32>
    %13 = vector.extract_strided_slice %2 {offsets = [0, 18], sizes = [56, 8], strides = [1, 1]} : vector<56x42xf32> to vector<56x8xf32>
    %14 = vector.extract_strided_slice %2 {offsets = [0, 26], sizes = [56, 8], strides = [1, 1]} : vector<56x42xf32> to vector<56x8xf32>
    %15 = vector.extract_strided_slice %2 {offsets = [0, 34], sizes = [56, 8], strides = [1, 1]} : vector<56x42xf32> to vector<56x8xf32>
    %16 = arith.mulf %13, %13 : vector<56x8xf32>
    %17 = arith.mulf %14, %14 : vector<56x8xf32>
    %18 = arith.addf %16, %17 : vector<56x8xf32>
    %19 = arith.mulf %15, %15 : vector<56x8xf32>
    %20 = arith.addf %18, %19 : vector<56x8xf32>
    %21 = math.sqrt %20 : vector<56x8xf32>
    %c0_3 = arith.constant 0 : index
    %c0_4 = arith.constant 0 : index
    %22 = vector.load %arg1[%c0_3, %c0_4] : memref<56x16xf32, #tpu.memory_space<vmem>>, vector<56x16xf32>
    %c0_5 = arith.constant 0 : index
    %c0_6 = arith.constant 0 : index
    %23 = vector.load %arg4[%c0_5, %c0_6] : memref<16x12xf32, #tpu.memory_space<vmem>>, vector<16x12xf32>
    %cst_7 = arith.constant dense<0.000000e+00> : vector<56x12xf32>
    %24 = tpu.matmul %22, %23, %cst_7 {dimension_numbers = #tpu.dot_dimension_numbers<[1], [0], [0], [1], [0, 0, 1, 1], [], []>} : vector<56x16xf32>, vector<16x12xf32>, vector<56x12xf32> -> vector<56x12xf32>
    %c0_8 = arith.constant 0 : index
    %c0_9 = arith.constant 0 : index
    %25 = vector.load %arg5[%c0_8, %c0_9] : memref<8x12xf32, #tpu.memory_space<vmem>>, vector<8x12xf32>
    %cst_10 = arith.constant dense<0.000000e+00> : vector<56x12xf32>
    %26 = tpu.matmul %21, %25, %cst_10 {dimension_numbers = #tpu.dot_dimension_numbers<[1], [0], [0], [1], [0, 0, 1, 1], [], []>} : vector<56x8xf32>, vector<8x12xf32>, vector<56x12xf32> -> vector<56x12xf32>
    %27 = arith.addf %24, %26 : vector<56x12xf32>
    %c0_11 = arith.constant 0 : index
    %c0_12 = arith.constant 0 : index
    %28 = vector.load %arg6[%c0_11, %c0_12] : memref<1x12xf32, #tpu.memory_space<vmem>>, vector<1x12xf32>
    %29 = vector.broadcast %28 : vector<1x12xf32> to vector<56x12xf32>
    %30 = arith.addf %27, %29 : vector<56x12xf32>
    %cst_13 = arith.constant 0.000000e+00 : f32
    %31 = vector.broadcast %cst_13 : f32 to vector<56x12xf32>
    %32 = arith.maximumf %30, %31 : vector<56x12xf32>
    %c0_14 = arith.constant 0 : index
    %c0_15 = arith.constant 0 : index
    %33 = vector.load %arg7[%c0_14, %c0_15] : memref<56x12xf32, #tpu.memory_space<vmem>>, vector<56x12xf32>
    tpu.vector_store %arg7[%c0_14, %c0_15], %32 {strides = array<i32>} : memref<56x12xf32, #tpu.memory_space<vmem>>, vector<56x12xf32>,
    %34 = arith.negf %12 : vector<56x6xf32>
    %35 = math.exp %34 : vector<56x6xf32>
    %cst_16 = arith.constant 1.000000e+00 : f32
    %36 = vector.broadcast %cst_16 : f32 to vector<56x6xf32>
    %37 = arith.addf %36, %35 : vector<56x6xf32>
    %38 = arith.divf %36, %37 : vector<56x6xf32>
    %39 = tpu.concatenate %38, %38, %38 in 1 : vector<56x6xf32>, vector<56x6xf32>, vector<56x6xf32> -> vector<56x18xf32>
    %40 = arith.mulf %39, %3 : vector<56x18xf32>
    %c0_17 = arith.constant 0 : index
    %c0_18 = arith.constant 0 : index
    %41 = vector.load %arg8[%c0_17, %c0_18] : memref<56x18xf32, #tpu.memory_space<vmem>>, vector<56x18xf32>
    tpu.vector_store %arg8[%c0_17, %c0_18], %40 {strides = array<i32>} : memref<56x18xf32, #tpu.memory_space<vmem>>, vector<56x18xf32>,
    return
  }
  func.func @transform_0(%arg0: i32) -> (i32, i32) {
    %c0_i32 = arith.constant 0 : i32
    %c0_i32_0 = arith.constant 0 : i32
    return %arg0, %c0_i32 : i32, i32
  }
  func.func @transform_1(%arg0: i32) -> (i32, i32) {
    %c0_i32 = arith.constant 0 : i32
    %c0_i32_0 = arith.constant 0 : i32
    return %arg0, %c0_i32 : i32, i32
  }
  func.func @transform_2(%arg0: i32) -> (i32, i32) {
    %c0_i32 = arith.constant 0 : i32
    %c0_i32_0 = arith.constant 0 : i32
    %c0_i32_1 = arith.constant 0 : i32
    return %c0_i32, %c0_i32_0 : i32, i32
  }
  func.func @transform_3(%arg0: i32) -> (i32, i32) {
    %c0_i32 = arith.constant 0 : i32
    %c0_i32_0 = arith.constant 0 : i32
    %c0_i32_1 = arith.constant 0 : i32
    return %c0_i32, %c0_i32_0 : i32, i32
  }
  func.func @transform_4(%arg0: i32) -> (i32, i32) {
    %c0_i32 = arith.constant 0 : i32
    %c0_i32_0 = arith.constant 0 : i32
    %c0_i32_1 = arith.constant 0 : i32
    return %c0_i32, %c0_i32_0 : i32, i32
  }
  func.func @transform_5(%arg0: i32) -> (i32, i32) {
    %c0_i32 = arith.constant 0 : i32
    %c0_i32_0 = arith.constant 0 : i32
    %c0_i32_1 = arith.constant 0 : i32
    return %c0_i32, %c0_i32_0 : i32, i32
  }
  func.func @transform_6(%arg0: i32) -> (i32, i32) {
    %c0_i32 = arith.constant 0 : i32
    %c0_i32_0 = arith.constant 0 : i32
    return %arg0, %c0_i32 : i32, i32
  }
  func.func @transform_7(%arg0: i32) -> (i32, i32) {
    %c0_i32 = arith.constant 0 : i32
    %c0_i32_0 = arith.constant 0 : i32
    return %arg0, %c0_i32 : i32, i32
  }
}

</mosaic_0001>

<bundles_post_ra>
// kernel: gvp_forward.1
= control target key start
LH: loop header
LB: loop body
LE: loop exit
PB: predicated region body
PF: predicated region fallthrough
CT: control target
= control target key end

     0   :  { %s2603_s0 = inlined_call_operand.vmem [shape: f32[100,16], index: 0, kind: input, shape index: {}]   ;;  %s2604_s1 = inlined_call_operand.vmem [shape: f32[100,24], index: 1, kind: input, shape index: {}]   ;;  %s2605_s2 = inlined_call_operand.vmem [shape: f32[24,42], index: 2, kind: input, shape index: {}]   ;;  %s2606_s3 = inlined_call_operand.vmem [shape: f32[16,12], index: 3, kind: input, shape index: {}]   ;;  %s2607_s4 = inlined_call_operand.vmem [shape: f32[8,12], index: 4, kind: input, shape index: {}]   ;;  %s2608_s5 = inlined_call_operand.vmem [shape: f32[1,12], index: 5, kind: input, shape index: {}]   ;;  %s2609_s6 = inlined_call_operand.vmem [shape: f32[100,12], index: 6, kind: output, shape index: {0}]   ;;  %s2610_s7 = inlined_call_operand.vmem [shape: f32[100,18], index: 7, kind: output, shape index: {1}]  }
   0x1   :  { %2611 = sst [smem:[#allocation4_spill]] %s2603_s0 }
   0x2   :  { %s2199_s24 = smov 0   ;;  %s2201_s25 = smov 0  }
   0x3   :  { %s2203_s26 = smov 0  }
   0x4 LB: > { %s2212_s27 = sadd.s32 4294967295, %s2083_s26   ;;  %s2214_s28 = sadd.s32 1, %s2083_s26   ;;  %s2083_s26 = sphi %s2203_s26, %s2622_s26   ;;  %s2079_s25 = sphi %s2201_s25, %s2621_s25   ;;  %s2075_s24 = sphi %s2199_s24, %s2620_s24  }
   0x5   : > { %s158_s29 = ssub.s32 %s2083_s26, %s2214_s28  ;;  %s161_s30 = sadd.s32 1, %s2079_s25 }
   0x6   : > { %p159_p0 = scmp.eq.s32.totalorder %s158_s29, 0  ;;  %p171_p1 = scmp.ne.s32.totalorder %s2079_s25, %s2075_s24 }
   0x7   : > { %p172_p2 = scmp.eq.s32.totalorder %s2212_s27, 1  ;;  %p1602_p3 = scmp.ge.s32.totalorder %s2083_s26, 1 }
   0x8   : > { %s2222_s8 = scalar_select %p159_p0, %s2079_s25, %s161_s30  }
   0x9   : > { %p2224_p4 = por %p172_p2, %p171_p1  ;;  %p268_p5 = scmp.lt.s32.totalorder %s2083_s26, 3 }
   0xb   : > { %p269_p6 = pnand %p1602_p3, %p268_p5 }
   0xc   : > { %v361_v0 = vld [vmem:[%s2605_s2] sm:$0xff] (!%p269_p6)  ;;  %v362_v1 = vld [vmem:[%s2605_s2 + $0x8] sm:$0xff] (!%p269_p6)  ;;  %v2149_v2 = vmov (!%p269_p6), 0.0|0.0   ;;  %vm2150_vm0 = vmmov (!%p269_p6), 0   ;;  %v2151_v4 = vmov (!%p269_p6), 0.0   ;;  %s2238_s14 = smul.u32 (!%p269_p6), 7, %s2212_s27 }
   0xd   : > { %272 = sbr.rel (%p269_p6) target bundleno = 890 (0x37a), region = 44  ;;  %1760 = vmatprep.subr.bf16.mxu0 (!%p269_p6), %v2149_v2  ;;  %v1761_v3 = vpack.c.bf16 (!%p269_p6), %v362_v1, %v361_v0  ;;  %1691 = vmatprep.mubr.msk.f32.mxu0 (!%p269_p6), %vm2150_vm0, %v2151_v4  ;;  %v363_v5 = vld [vmem:[%s2605_s2 + $0x10] sm:$0xff] (!%p269_p6)  ;;  %vm364_vm1 = vcmask (!%p269_p6), 195584   ;;  %s2152_s22 = smov (!%p269_p6), 120   ;;  %v719_v34 = vld [vmem:[%s2607_s4] sm:$0xff] (!%p269_p6) }
   0xe   : > { %1766 = vmatprep.subr.mxu1 (!%p269_p6), %v2151_v4  ;;  %1723 = vmatprep.mubr.msk.f32.mxu1 (!%p269_p6), %vm2150_vm0, %v2151_v4  ;;  %p321_p7 = scmp.lt.s32.totalorder (!%p269_p6), %s2238_s14, 12  ;;  %s2153_s23 = smov (!%p269_p6), 112  }
   0xf   : > { %1762 = vmatpush3.bf16.msra.mxu0 (!%p269_p6), %v1761_v3  ;;  %1767 = vmatpush3.msra.mxu1 (!%p269_p6), %v719_v34  ;;  %s2154_s30 = smov (!%p269_p6), 110   ;;  %s2155_s10 = smov (!%p269_p6), 122  }
  0x10   : > { %1689 = vmatprep.subr.mxu0 (!%p269_p6), %v2151_v4  ;;  %1763 = vmatprep.subr.bf16.mxu1 (!%p269_p6), %v2149_v2  ;;  %s2156_s11 = smov (!%p269_p6), 116   ;;  %s2613_s0 = sld [smem:[#allocation4_spill]] (!%p269_p6) }
  0x13   : > { %1690 = vmatpush3.msra.mxu0 (!%p269_p6), %v363_v5 }
  0x14   : > { %s2249_s17 = scalar_select %p321_p7, %s2238_s14, 12  ;;  %1712 = vmatprep.subr.mxu0 %v2151_v4 }
  0x16   : > { %s1603_s18 = sshll.u32 %s2249_s17, 3  ;;  %s2157_s17 = smov 12  }
  0x17   : > { %s338_s21 = scalar_lea.vmem %s2604_s1, %s1603_s18 }
  0x18   : > { %v354_v6 = vld [vmem:[%s338_s21] sm:$0xff]  ;;  %v355_v7 = vld [vmem:[%s338_s21 + $0x8] sm:$0xff]  ;;  %v356_v8 = vld [vmem:[%s338_s21 + $0x10] sm:$0xff] }
  0x19   : > { %1692 = vmatmul.mubr.msk.f32.vlgmr.msra.gmra.mrb[0].mxu0 %vm364_vm1, %v354_v6  ;;  %v357_v9 = vld [vmem:[%s338_s21 + $0x18] sm:$0xff]  ;;  %v358_v10 = vld [vmem:[%s338_s21 + $0x20] sm:$0xff]  ;;  %v359_v11 = vld [vmem:[%s338_s21 + $0x28] sm:$0xff] }
  0x1a   : > { %1694 = vmatprep.mubr.msk.f32.mxu0 %vm2150_vm0, %v2151_v4  ;;  %v360_v12 = vld [vmem:[%s338_s21 + $0x30] sm:$0xff]  ;;  %1713 = vmatpush3.msra.mxu0 %v719_v34  ;;  %s2387_s21 = scalar_lea.vmem %s2613_s0, %s1603_s18  ;;  %s2158_s18 = smov 6  }
  0x1d   : > { %1695 = vmatmul.mubr.msk.f32.gmra.mrb[2].mxu0 %vm364_vm1, %v355_v7 }
  0x1e   : > { %1697 = vmatprep.mubr.msk.f32.mxu0 %vm2150_vm0, %v2151_v4 }
  0x21   : > { %1698 = vmatmul.mubr.msk.f32.gmra.mrb[4].mxu0 %vm364_vm1, %v356_v8 }
  0x22   : > { %1700 = vmatprep.mubr.msk.f32.mxu0 %vm2150_vm0, %v2151_v4 }
  0x25   : > { %1701 = vmatmul.mubr.msk.f32.gmra.mrb[6].mxu0 %vm364_vm1, %v357_v9 }
  0x26   : > { %1703 = vmatprep.mubr.msk.f32.mxu0 %vm2150_vm0, %v2151_v4 }
  0x29   : > { %1704 = vmatmul.mubr.msk.f32.gmra.mrb[8].mxu0 %vm364_vm1, %v358_v10 }
  0x2a   : > { %1706 = vmatprep.mubr.msk.f32.mxu0 %vm2150_vm0, %v2151_v4 }
  0x2d   : > { %1707 = vmatmul.mubr.msk.f32.gmra.mrb[10].mxu0 %vm364_vm1, %v359_v11 }
  0x2e   : > { %1709 = vmatprep.mubr.msk.f32.mxu0 %vm2150_vm0, %v2151_v4 }
  0x31   : > { %1710 = vmatmul.mubr.msk.f32.gmra.mrb[12].mxu0 %vm364_vm1, %v360_v12  ;;  %vm741_vm1 = vcmask 64512  }
  0x32   : > { %1714 = vmatprep.mubr.msk.f32.mxu0 %vm2150_vm0, %v2151_v4 }
  0xec   : > { %v2279_v13 = vpop.f32.mrb[0].mxu0 }
  0xed   : > { %v1693_v14 = vpop.f32.mrb[1].mxu0  ;;  %v2318_v31 = vmul.f32 %v2279_v13, %v2279_v13 }
  0xf0   : > { %v2281_v15 = vpop.f32.mrb[2].mxu0 }
  0xf1   : > { %v1696_v16 = vpop.f32.mrb[3].mxu0  ;;  %v2324_v32 = vmul.f32 %v2281_v15, %v2281_v15 }
  0xf4   : > { %v2283_v17 = vpop.f32.mrb[4].mxu0 }
  0xf5   : > { %v1699_v18 = vpop.f32.mrb[5].mxu0  ;;  %v2330_v33 = vmul.f32 %v2283_v17, %v2283_v17 }
  0xf8   : > { %v2285_v19 = vpop.f32.mrb[6].mxu0 }
  0xf9   : > { %v2289_v20 = vmul.f32 %v2285_v19, %v2285_v19  ;;  %v1702_v21 = vpop.f32.mrb[7].mxu0 }
  0xfb   : > { %611 = vrot.lane.b32.xlu0 %v2289_v20, %s2152_s22 }
  0xfc   : > { %v2292_v22 = vpop.f32.mrb[8].mxu0 }
  0xfd   : > { %v2296_v23 = vmul.f32 %v2292_v22, %v2292_v22  ;;  %v1705_v24 = vpop.f32.mrb[9].mxu0 }
  0xff   : > { %639 = vrot.lane.b32.xlu0 %v2289_v20, %s2153_s23  ;;  %613 = vrot.lane.b32.xlu1 %v2296_v23, %s2152_s22 }
 0x100   : > { %v2300_v25 = vpop.f32.mrb[10].mxu0 }
 0x101   : > { %v2304_v26 = vmul.f32 %v2300_v25, %v2300_v25  ;;  %v1708_v27 = vpop.f32.mrb[11].mxu0 }
 0x103   : > { %641 = vrot.lane.b32.xlu1 %v2296_v23, %s2153_s23  ;;  %615 = vrot.lane.b32.xlu0 %v2304_v26, %s2152_s22 }
 0x104   : > { %v2308_v28 = vpop.f32.mrb[12].mxu0 }
 0x105   : > { %v2312_v29 = vmul.f32 %v2308_v28, %v2308_v28  ;;  %v1711_v30 = vpop.f32.mrb[13].mxu0 }
 0x107   : > { %643 = vrot.lane.b32.xlu1 %v2304_v26, %s2153_s23  ;;  %617 = vrot.lane.b32.xlu0 %v2312_v29, %s2152_s22 }
 0x10b   : > { %645 = vrot.lane.b32.xlu1 %v2312_v29, %s2153_s23  ;;  %605 = vrot.lane.b32.xlu0 %v2318_v31, %s2152_s22 }
 0x10f   : > { %633 = vrot.lane.b32.xlu1 %v2318_v31, %s2153_s23  ;;  %607 = vrot.lane.b32.xlu0 %v2324_v32, %s2152_s22 }
 0x113   : > { %635 = vrot.lane.b32.xlu1 %v2324_v32, %s2153_s23  ;;  %609 = vrot.lane.b32.xlu0 %v2330_v33, %s2152_s22  ;;  %s307_s22 = sand.u32 1, %s2075_s24  }
 0x117   : > { %637 = vrot.lane.b32.xlu1 %v2330_v33, %s2153_s23  ;;  %s2441_s23 = smul.u32 56, %s307_s22 }
 0x119   : > { %s2447_s26 = scalar_lea.vmem [#allocation3], %s2441_s23  }
 0x16d   : > { %v612_v35 = vpop.permute.xlu0 %611 }
 0x16e   : > { %v629_v36 = vadd.f32 %v612_v35, %v2289_v20 }
 0x171   : > { %v640_v37 = vpop.permute.xlu0 %639  ;;  %v614_v38 = vpop.permute.xlu1 %613 }
 0x172   : > { %v657_v39 = vadd.f32 %v640_v37, %v629_v36  ;;  %v630_v40 = vadd.f32 %v614_v38, %v2296_v23 }
 0x174   : > { %1933 = vrsqrt.f32 %v657_v39  ;;  %vm684_vm2 = vcmp.eq.f32.partialorder %v657_v39, inf  ;;  %v687_v55 = vand.u32 2147483648, %v657_v39  ;;  %vm686_vm3 = vcmp.eq.f32.partialorder %v657_v39, 0.0 }
 0x175   : > { %v642_v41 = vpop.permute.xlu1 %641  ;;  %v616_v42 = vpop.permute.xlu0 %615 }
 0x176   : > { %v658_v43 = vadd.f32 %v642_v41, %v630_v40  ;;  %v631_v44 = vadd.f32 %v616_v42, %v2304_v26 }
 0x178   : > { %1935 = vrsqrt.f32 %v658_v43  ;;  %vm691_vm4 = vcmp.eq.f32.partialorder %v658_v43, inf  ;;  %v694_v0 = vand.u32 2147483648, %v658_v43  ;;  %vm693_vm5 = vcmp.eq.f32.partialorder %v658_v43, 0.0 }
 0x179   : > { %v644_v45 = vpop.permute.xlu1 %643  ;;  %v618_v46 = vpop.permute.xlu0 %617 }
 0x17a   : > { %v659_v47 = vadd.f32 %v644_v45, %v631_v44  ;;  %v632_v48 = vadd.f32 %v618_v46, %v2312_v29 }
 0x17c   : > { %1937 = vrsqrt.f32 %v659_v47  ;;  %vm698_vm6 = vcmp.eq.f32.partialorder %v659_v47, inf  ;;  %v701_v10 = vand.u32 2147483648, %v659_v47  ;;  %vm700_vm7 = vcmp.eq.f32.partialorder %v659_v47, 0.0 }
 0x17d   : > { %v646_v49 = vpop.permute.xlu1 %645  ;;  %v606_v50 = vpop.permute.xlu0 %605 }
 0x17e   : > { %v1934_v51 = vpop.eup %1933  ;;  %v660_v52 = vadd.f32 %v646_v49, %v632_v48  ;;  %v626_v54 = vadd.f32 %v606_v50, %v2318_v31  ;;  %v717_v49 = vld [vmem:[%s2606_s3] sm:$0xff]  ;;  %v718_v50 = vld [vmem:[%s2606_s3 + $0x8] sm:$0xff] }
 0x17f   : > { %v683_v53 = vmul.f32 %v1934_v51, %v657_v39  ;;  %v1764_v51 = vpack.c.bf16 %v718_v50, %v717_v49 }
 0x180   : > { %1939 = vrsqrt.f32 %v660_v52  ;;  %vm705_vm8 = vcmp.eq.f32.partialorder %v660_v52, inf  ;;  %v708_v24 = vand.u32 2147483648, %v660_v52  ;;  %vm707_vm9 = vcmp.eq.f32.partialorder %v660_v52, 0.0 }
 0x181   : > { %v634_v56 = vpop.permute.xlu1 %633  ;;  %v608_v57 = vpop.permute.xlu0 %607  ;;  %v685_v58 = vsel %vm684_vm2, %v657_v39, %v683_v53  ;;  %vm856_vm2 = vcmask 130048  }
 0x182   : > { %v1936_v59 = vpop.eup %1935  ;;  %v654_v60 = vadd.f32 %v634_v56, %v626_v54  ;;  %v688_v61 = vsel %vm686_vm3, %v687_v55, %v685_v58  ;;  %v627_v63 = vadd.f32 %v608_v57, %v2324_v32  ;;  %v710_v56 = vld [vmem:[%s2387_s21] sm:$0xff]  ;;  %v711_v58 = vld [vmem:[%s2387_s21 + $0x8] sm:$0xff] }
 0x183   : > { %733 = vrot.lane.b32.xlu0 %v688_v61, %s2154_s30  ;;  %v690_v62 = vmul.f32 %v1936_v59, %v658_v43 }
 0x184   : > { %1941 = vrsqrt.f32 %v654_v60  ;;  %vm663_vm10 = vcmp.eq.f32.partialorder %v654_v60, inf  ;;  %v666_v36 = vand.u32 2147483648, %v654_v60  ;;  %vm665_vm11 = vcmp.eq.f32.partialorder %v654_v60, 0.0 }
 0x185   : > { %v636_v1 = vpop.permute.xlu1 %635  ;;  %v610_v2 = vpop.permute.xlu0 %609  ;;  %v692_v3 = vsel %vm691_vm4, %v658_v43, %v690_v62 }
 0x186   : > { %v1938_v5 = vpop.eup %1937  ;;  %v655_v6 = vadd.f32 %v636_v1, %v627_v63  ;;  %v695_v7 = vsel %vm693_vm5, %v694_v0, %v692_v3  ;;  %v628_v9 = vadd.f32 %v610_v2, %v2330_v33  ;;  %v713_v63 = vld [vmem:[%s2387_s21 + $0x18] sm:$0xff]  ;;  %v714_v2 = vld [vmem:[%s2387_s21 + $0x20] sm:$0xff] }
 0x187   : > { %735 = vrot.lane.b32.xlu1 %v695_v7, %s2154_s30  ;;  %v697_v8 = vmul.f32 %v1938_v5, %v659_v47 }
 0x188   : > { %1943 = vrsqrt.f32 %v655_v6  ;;  %vm670_vm12 = vcmp.eq.f32.partialorder %v655_v6, inf  ;;  %v673_v41 = vand.u32 2147483648, %v655_v6  ;;  %vm672_vm13 = vcmp.eq.f32.partialorder %v655_v6, 0.0 }
 0x189   : > { %v638_v11 = vpop.permute.xlu1 %637  ;;  %v699_v12 = vsel %vm698_vm6, %v659_v47, %v697_v8 }
 0x18a   : > { %v1940_v14 = vpop.eup %1939  ;;  %v656_v16 = vadd.f32 %v638_v11, %v628_v9  ;;  %v702_v18 = vsel %vm700_vm7, %v701_v10, %v699_v12  ;;  %v716_v9 = vld [vmem:[%s2387_s21 + $0x30] sm:$0xff] }
 0x18b   : > { %737 = vrot.lane.b32.xlu0 %v702_v18, %s2154_s30  ;;  %v704_v21 = vmul.f32 %v1940_v14, %v660_v52 }
 0x18c   : > { %1945 = vrsqrt.f32 %v656_v16  ;;  %vm677_vm14 = vcmp.eq.f32.partialorder %v656_v16, inf  ;;  %v680_v46 = vand.u32 2147483648, %v656_v16  ;;  %vm679_vm15 = vcmp.eq.f32.partialorder %v656_v16, 0.0 }
 0x18d   : > { %v706_v27 = vsel %vm705_vm8, %v660_v52, %v704_v21 }
 0x18e   : > { %v1942_v30 = vpop.eup %1941  ;;  %v709_v34 = vsel %vm707_vm9, %v708_v24, %v706_v27 }
 0x18f   : > { %739 = vrot.lane.b32.xlu1 %v709_v34, %s2154_s30  ;;  %v662_v35 = vmul.f32 %v1942_v30, %v654_v60 }
 0x191   : > { %v664_v37 = vsel %vm663_vm10, %v654_v60, %v662_v35  ;;  %v712_v60 = vld [vmem:[%s2387_s21 + $0x10] sm:$0xff] }
 0x192   : > { %v1944_v38 = vpop.eup %1943  ;;  %v667_v39 = vsel %vm665_vm11, %v666_v36, %v664_v37 }
 0x193   : > { %727 = vrot.lane.b32.xlu0 %v667_v39, %s2154_s30  ;;  %v669_v40 = vmul.f32 %v1944_v38, %v655_v6 }
 0x195   : > { %v671_v42 = vsel %vm670_vm12, %v655_v6, %v669_v40  ;;  %v715_v6 = vld [vmem:[%s2387_s21 + $0x28] sm:$0xff] }
 0x196   : > { %v1946_v43 = vpop.eup %1945  ;;  %v674_v44 = vsel %vm672_vm13, %v673_v41, %v671_v42 }
 0x197   : > { %729 = vrot.lane.b32.xlu1 %v674_v44, %s2154_s30  ;;  %v676_v45 = vmul.f32 %v1946_v43, %v656_v16 }
 0x199   : > { %v678_v47 = vsel %vm677_vm14, %v656_v16, %v676_v45 }
 0x19a   : > { %v681_v48 = vsel %vm679_vm15, %v680_v46, %v678_v47 }
 0x19b   : > { %500 = vrot.lane.b32.xlu1 %v2318_v31, %s2155_s10  ;;  %731 = vrot.lane.b32.xlu0 %v681_v48, %s2154_s30  ;;  %s2485_s30 = scalar_lea.vmem [#allocation2], %s2441_s23  }
 0x19f   : > { %504 = vrot.lane.b32.xlu1 %v2330_v33, %s2155_s10  ;;  %502 = vrot.lane.b32.xlu0 %v2324_v32, %s2155_s10 }
 0x1a3   : > { %508 = vrot.lane.b32.xlu1 %v2296_v23, %s2155_s10  ;;  %506 = vrot.lane.b32.xlu0 %v2289_v20, %s2155_s10 }
 0x1a7   : > { %512 = vrot.lane.b32.xlu1 %v2312_v29, %s2155_s10  ;;  %510 = vrot.lane.b32.xlu0 %v2304_v26, %s2155_s10  ;;  %s1140_s10 = ssub.s32 (%p2224_p4), 13, %s2238_s14 }
 0x1a8   : > { %p1141_p8 = scmp.lt.s32.totalorder (%p2224_p4), %s1140_s10, 7 }
 0x1ab   : > { %530 = vrot.lane.b32.xlu1 %v2324_v32, %s2156_s11  ;;  %528 = vrot.lane.b32.xlu0 %v2318_v31, %s2156_s11 }
 0x1af   : > { %534 = vrot.lane.b32.xlu1 %v2289_v20, %s2156_s11  ;;  %532 = vrot.lane.b32.xlu0 %v2330_v33, %s2156_s11 }
 0x1b3   : > { %538 = vrot.lane.b32.xlu1 %v2304_v26, %s2156_s11  ;;  %536 = vrot.lane.b32.xlu0 %v2296_v23, %s2156_s11 }
 0x1b7   : > { %540 = vrot.lane.b32.xlu0 %v2312_v29, %s2156_s11  ;;  %s1656_s11 = smul.u32 (%p2224_p4), 56, %s2212_s27 }
 0x1b9   : > { %s2508_s15 = scalar_lea.vmem (%p2224_p4), %s2609_s6, %s1656_s11  }
 0x1f5   : > { %v734_v52 = vpop.permute.xlu0 %733 }
 0x1f6   : > { %1724 = vmatmul.mubr.msk.f32.vlgmr.msra.gmra.mrb[0].mxu1 %vm741_vm1, %v734_v52 }
 0x1f7   : > { %1765 = vmatpush3.bf16.msra.mxu1 %v1764_v51  ;;  %1726 = vmatprep.mubr.msk.f32.mxu1 %vm2150_vm0, %v2151_v4 }
 0x1f9   : > { %v736_v53 = vpop.permute.xlu1 %735 }
 0x1fa   : > { %1727 = vmatmul.mubr.msk.f32.gmra.mrb[2].mxu1 %vm741_vm1, %v736_v53 }
 0x1fb   : > { %1729 = vmatprep.mubr.msk.f32.mxu1 %vm2150_vm0, %v2151_v4 }
 0x1fd   : > { %v738_v54 = vpop.permute.xlu0 %737 }
 0x1fe   : > { %1730 = vmatmul.mubr.msk.f32.gmra.mrb[4].mxu1 %vm741_vm1, %v738_v54 }
 0x1ff   : > { %1732 = vmatprep.mubr.msk.f32.mxu1 %vm2150_vm0, %v2151_v4 }
 0x201   : > { %v740_v55 = vpop.permute.xlu1 %739 }
 0x202   : > { %1733 = vmatmul.mubr.msk.f32.gmra.mrb[6].mxu1 %vm741_vm1, %v740_v55 }
 0x203   : > { %1739 = vmatprep.mubr.msk.f32.mxu1 %vm2150_vm0, %v2151_v4 }
 0x205   : > { %v728_v57 = vpop.permute.xlu0 %727 }
 0x206   : > { %1715 = vmatmul.mubr.msk.f32.vlgmr.msra.gmra.mrb[14].mxu0 %vm741_vm1, %v728_v57  ;;  %1740 = vmatmul.mubr.msk.f32.vlgmr.msra.gmra.mrb[8].mxu1 %vm856_vm2, %v710_v56 }
 0x207   : > { %1717 = vmatprep.mubr.msk.f32.mxu0 %vm2150_vm0, %v2151_v4  ;;  %1742 = vmatprep.mubr.msk.f32.mxu1 %vm2150_vm0, %v2151_v4 }
 0x209   : > { %v730_v59 = vpop.permute.xlu1 %729 }
 0x20a   : > { %1718 = vmatmul.mubr.msk.f32.gmra.mrb[16].mxu0 %vm741_vm1, %v730_v59  ;;  %1743 = vmatmul.mubr.msk.f32.gmra.mrb[10].mxu1 %vm856_vm2, %v711_v58 }
 0x20b   : > { %1720 = vmatprep.mubr.msk.f32.mxu0 %vm2150_vm0, %v2151_v4  ;;  %1745 = vmatprep.mubr.msk.f32.mxu1 %vm2150_vm0, %v2151_v4 }
 0x20d   : > { %v501_v61 = vpop.permute.xlu1 %500  ;;  %v732_v62 = vpop.permute.xlu0 %731 }
 0x20e   : > { %1721 = vmatmul.mubr.msk.f32.gmra.mrb[18].mxu0 %vm741_vm1, %v732_v62  ;;  %1746 = vmatmul.mubr.msk.f32.gmra.mrb[12].mxu1 %vm856_vm2, %v712_v60  ;;  %v521_v10 = vadd.f32 %v501_v61, %v2318_v31  ;;  %vm1098_vm1 = vcmask 48128  }
 0x20f   : > { %1748 = vmatprep.mubr.msk.f32.mxu1 %vm2150_vm0, %v2151_v4 }
 0x211   : > { %v505_v0 = vpop.permute.xlu1 %504  ;;  %v503_v1 = vpop.permute.xlu0 %502 }
 0x212   : > { %1749 = vmatmul.mubr.msk.f32.gmra.mrb[14].mxu1 %vm856_vm2, %v713_v63  ;;  %v522_v11 = vadd.f32 %v503_v1, %v2324_v32  ;;  %v523_v21 = vadd.f32 %v505_v0, %v2330_v33 }
 0x213   : > { %1751 = vmatprep.mubr.msk.f32.mxu1 %vm2150_vm0, %v2151_v4 }
 0x215   : > { %v509_v3 = vpop.permute.xlu1 %508  ;;  %v507_v5 = vpop.permute.xlu0 %506 }
 0x216   : > { %1752 = vmatmul.mubr.msk.f32.gmra.mrb[16].mxu1 %vm856_vm2, %v714_v2  ;;  %v524_v24 = vadd.f32 %v507_v5, %v2289_v20  ;;  %v525_v31 = vadd.f32 %v509_v3, %v2296_v23 }
 0x217   : > { %1754 = vmatprep.mubr.msk.f32.mxu1 %vm2150_vm0, %v2151_v4 }
 0x219   : > { %v513_v7 = vpop.permute.xlu1 %512  ;;  %v511_v8 = vpop.permute.xlu0 %510 }
 0x21a   : > { %1755 = vmatmul.mubr.msk.f32.gmra.mrb[18].mxu1 %vm856_vm2, %v715_v6  ;;  %v526_v32 = vadd.f32 %v511_v8, %v2304_v26  ;;  %v527_v33 = vadd.f32 %v513_v7, %v2312_v29 }
 0x21b   : > { %1757 = vmatprep.mubr.msk.f32.mxu1 %vm2150_vm0, %v2151_v4 }
 0x21d   : > { %v531_v12 = vpop.permute.xlu1 %530  ;;  %v529_v14 = vpop.permute.xlu0 %528 }
 0x21e   : > { %v550_v16 = vadd.f32 %v531_v12, %v522_v11  ;;  %v549_v18 = vadd.f32 %v529_v14, %v521_v10  ;;  %1758 = vmatmul.mubr.msk.f32.gmra.mrb[20].mxu1 %vm856_vm2, %v716_v9  ;;  %vm999_vm2 = vcmask 97280  }
 0x220   : > { %1947 = vrsqrt.f32 %v550_v16  ;;  %vm565_vm0 = vcmp.eq.f32.partialorder %v550_v16, inf  ;;  %v568_v23 = vand.u32 2147483648, %v550_v16  ;;  %vm567_vm3 = vcmp.eq.f32.partialorder %v550_v16, 0.0 }
 0x221   : > { %1949 = vrsqrt.f32 %v549_v18  ;;  %v535_v27 = vpop.permute.xlu1 %534  ;;  %v533_v30 = vpop.permute.xlu0 %532  ;;  %vm558_vm4 = vcmp.eq.f32.partialorder %v549_v18, inf  ;;  %v561_v44 = vand.u32 2147483648, %v549_v18  ;;  %vm560_vm5 = vcmp.eq.f32.partialorder %v549_v18, 0.0 }
 0x222   : > { %v552_v4 = vadd.f32 %v535_v27, %v524_v24  ;;  %v551_v34 = vadd.f32 %v533_v30, %v523_v21 }
 0x224   : > { %1951 = vrsqrt.f32 %v552_v4  ;;  %vm579_vm6 = vcmp.eq.f32.partialorder %v552_v4, inf  ;;  %v582_v52 = vand.u32 2147483648, %v552_v4  ;;  %vm572_vm7 = vcmp.eq.f32.partialorder %v551_v34, inf }
 0x225   : > { %1953 = vrsqrt.f32 %v551_v34  ;;  %v539_v35 = vpop.permute.xlu1 %538  ;;  %v537_v36 = vpop.permute.xlu0 %536  ;;  %v575_v55 = vand.u32 2147483648, %v551_v34  ;;  %vm581_vm8 = vcmp.eq.f32.partialorder %v552_v4, 0.0  ;;  %vm574_vm9 = vcmp.eq.f32.partialorder %v551_v34, 0.0 }
 0x226   : > { %v2431_v37 = vadd.f32 %v539_v35, %v526_v32  ;;  %v553_v38 = vadd.f32 %v537_v36, %v525_v31 }
 0x228   : > { %1955 = vrsqrt.f32 %v2431_v37  ;;  %vm593_vm10 = vcmp.eq.f32.partialorder %v2431_v37, inf  ;;  %vm586_vm11 = vcmp.eq.f32.partialorder %v553_v38, inf  ;;  %v589_v0 = vand.u32 2147483648, %v553_v38 }
 0x229   : > { %1957 = vrsqrt.f32 %v553_v38  ;;  %v541_v20 = vpop.permute.xlu0 %540  ;;  %vm588_vm12 = vcmp.eq.f32.partialorder %v553_v38, 0.0  ;;  %v596_v8 = vand.u32 2147483648, %v2431_v37  ;;  %vm595_vm14 = vcmp.eq.f32.partialorder %v2431_v37, 0.0 }
 0x22a   : > { %v1948_v39 = vpop.eup %1947  ;;  %v555_v40 = vadd.f32 %v541_v20, %v527_v33 }
 0x22b   : > { %v1950_v41 = vpop.eup %1949  ;;  %v564_v42 = vmul.f32 %v1948_v39, %v550_v16 }
 0x22c   : > { %v557_v26 = vmul.f32 %v1950_v41, %v549_v18  ;;  %1959 = vrsqrt.f32 %v555_v40  ;;  %vm600_vm13 = vcmp.eq.f32.partialorder %v555_v40, inf  ;;  %v603_v10 = vand.u32 2147483648, %v555_v40 }
 0x22d   : > { %v566_v43 = vsel %vm565_vm0, %v550_v16, %v564_v42  ;;  %vm602_vm15 = vcmp.eq.f32.partialorder %v555_v40, 0.0  ;;  %vm1120_vm0 = vcmask 146432  }
 0x22e   : > { %v1952_v45 = vpop.eup %1951  ;;  %v569_v46 = vsel %vm567_vm3, %v568_v23, %v566_v43  ;;  %v559_v47 = vsel %vm558_vm4, %v549_v18, %v557_v26 }
 0x22f   : > { %v1954_v29 = vpop.eup %1953  ;;  %v1628_v48 = vmul.f32 -1.442695, %v569_v46  ;;  %v562_v49 = vsel %vm560_vm5, %v561_v44, %v559_v47  ;;  %v578_v50 = vmul.f32 %v1952_v45, %v552_v4 }
 0x230   : > { %v1627_v51 = vmul.f32 -1.442695, %v562_v49  ;;  %v571_v53 = vmul.f32 %v1954_v29, %v551_v34 }
 0x231   : > { %1961 = vpow2.f32 %v1628_v48  ;;  %v580_v54 = vsel %vm579_vm6, %v552_v4, %v578_v50 }
 0x232   : > { %v1956_v56 = vpop.eup %1955  ;;  %1963 = vpow2.f32 %v1627_v51  ;;  %v573_v57 = vsel %vm572_vm7, %v551_v34, %v571_v53  ;;  %v583_v59 = vsel %vm581_vm8, %v582_v52, %v580_v54 }
 0x233   : > { %v1958_v58 = vpop.eup %1957  ;;  %v576_v60 = vsel %vm574_vm9, %v575_v55, %v573_v57  ;;  %v592_v61 = vmul.f32 %v1956_v56, %v2431_v37  ;;  %v1630_v2 = vmul.f32 -1.442695, %v583_v59 }
 0x234   : > { %v1629_v62 = vmul.f32 -1.442695, %v576_v60  ;;  %v585_v63 = vmul.f32 %v1958_v58, %v553_v38 }
 0x235   : > { %v594_v5 = vsel %vm593_vm10, %v2431_v37, %v592_v61 }
 0x236   : > { %v1960_v1 = vpop.eup %1959  ;;  %1965 = vpow2.f32 %v1629_v62  ;;  %v587_v3 = vsel %vm586_vm11, %v553_v38, %v585_v63  ;;  %v597_v11 = vsel %vm595_vm14, %v596_v8, %v594_v5 }
 0x237   : > { %v590_v6 = vsel %vm588_vm12, %v589_v0, %v587_v3  ;;  %v599_v7 = vmul.f32 %v1960_v1, %v555_v40  ;;  %1967 = vpow2.f32 %v1630_v2  ;;  %v1632_v24 = vmul.f32 -1.442695, %v597_v11 }
 0x238   : > { %v1631_v12 = vmul.f32 -1.442695, %v590_v6 }
 0x239   : > { %v601_v9 = vsel %vm600_vm13, %v555_v40, %v599_v7 }
 0x23a   : > { %v604_v16 = vsel %vm602_vm15, %v603_v10, %v601_v9  ;;  %1969 = vpow2.f32 %v1631_v12 }
 0x23b   : > { %v1962_v14 = vpop.eup %1961  ;;  %v1633_v27 = vmul.f32 -1.442695, %v604_v16 }
 0x23c   : > { %v1964_v18 = vpop.eup %1963  ;;  %v1029_v30 = vadd.f32 1.0, %v1962_v14 }
 0x23d   : > { %v1028_v21 = vadd.f32 1.0, %v1964_v18 }
 0x23f   : > { %1971 = vrcp.f32 %v1028_v21 }
 0x240   : > { %v1966_v4 = vpop.eup %1965  ;;  %1973 = vpow2.f32 %v1632_v24 }
 0x241   : > { %1975 = vpow2.f32 %v1633_v27  ;;  %v1030_v34 = vadd.f32 1.0, %v1966_v4  ;;  %v1968_v31 = vpop.eup %1967  ;;  %v1626_v4 = vld [vmem:[%s2608_s5] ss:$0 sm:$0xff] }
 0x242   : > { %1977 = vrcp.f32 %v1029_v30  ;;  %v1031_v32 = vadd.f32 1.0, %v1968_v31 }
 0x243   : > { %1979 = vrcp.f32 %v1030_v34 }
 0x244   : > { %v1970_v35 = vpop.eup %1969  ;;  %1981 = vrcp.f32 %v1031_v32 }
 0x245   : > { %v1032_v38 = vadd.f32 1.0, %v1970_v35 }
 0x247   : > { %1983 = vrcp.f32 %v1032_v38 }
 0x249   : > { %v1972_v36 = vpop.eup %1971 }
 0x24a   : > { %1077 = vrot.lane.b32.xlu0 %v1972_v36, %s2157_s17  ;;  %1056 = vrot.lane.b32.xlu1 %v1972_v36, %s2158_s18  ;;  %v1974_v37 = vpop.eup %1973 }
 0x24b   : > { %v1976_v33 = vpop.eup %1975  ;;  %v1033_v39 = vadd.f32 1.0, %v1974_v37 }
 0x24c   : > { %v1978_v20 = vpop.eup %1977  ;;  %v1034_v40 = vadd.f32 1.0, %v1976_v33 }
 0x24d   : > { %v1980_v41 = vpop.eup %1979  ;;  %1985 = vrcp.f32 %v1033_v39 }
 0x24e   : > { %1058 = vrot.lane.b32.xlu0 %v1978_v20, %s2158_s18  ;;  %1079 = vrot.lane.b32.xlu1 %v1978_v20, %s2157_s17  ;;  %1987 = vrcp.f32 %v1034_v40  ;;  %v1982_v42 = vpop.eup %1981 }
 0x251   : > { %v1984_v23 = vpop.eup %1983 }
 0x252   : > { %1081 = vrot.lane.b32.xlu0 %v1980_v41, %s2157_s17  ;;  %1060 = vrot.lane.b32.xlu1 %v1980_v41, %s2158_s18 }
 0x256   : > { %1062 = vrot.lane.b32.xlu0 %v1982_v42, %s2158_s18  ;;  %1083 = vrot.lane.b32.xlu1 %v1982_v42, %s2157_s17 }
 0x257   : > { %v1986_v26 = vpop.eup %1985 }
 0x258   : > { %v1988_v43 = vpop.eup %1987 }
 0x25a   : > { %1085 = vrot.lane.b32.xlu0 %v1984_v23, %s2157_s17  ;;  %1064 = vrot.lane.b32.xlu1 %v1984_v23, %s2158_s18 }
 0x25e   : > { %1066 = vrot.lane.b32.xlu0 %v1986_v26, %s2158_s18  ;;  %1068 = vrot.lane.b32.xlu1 %v1988_v43, %s2158_s18 }
 0x262   : > { %1089 = vrot.lane.b32.xlu0 %v1988_v43, %s2157_s17  ;;  %1087 = vrot.lane.b32.xlu1 %v1986_v26, %s2157_s17 }
 0x2bc   : > { %v1057_v44 = vpop.permute.xlu1 %1056  ;;  %v1078_v45 = vpop.permute.xlu0 %1077 }
 0x2bd   : > { %v1099_v46 = vsel %vm1098_vm1, %v1972_v36, %v1057_v44 }
 0x2be   : > { %v1106_v47 = vsel %vm999_vm2, %v1099_v46, %v1078_v45 }
 0x2bf   : > { %v1113_v29 = vmul.f32 %v1106_v47, %v2279_v13 }
 0x2c0   : > { %v1080_v48 = vpop.permute.xlu1 %1079  ;;  %v1059_v49 = vpop.permute.xlu0 %1058 }
 0x2c1   : > { %1121 = vst.msk [vmem:[%s2447_s26] sm:$0xff] %vm1120_vm0, %v1113_v29  ;;  %v1100_v50 = vsel %vm1098_vm1, %v1978_v20, %v1059_v49 }
 0x2c2   : > { %v1107_v51 = vsel %vm999_vm2, %v1100_v50, %v1080_v48 }
 0x2c3   : > { %v1114_v52 = vmul.f32 %v1107_v51, %v2281_v15 }
 0x2c4   : > { %v1061_v53 = vpop.permute.xlu1 %1060  ;;  %v1082_v54 = vpop.permute.xlu0 %1081 }
 0x2c5   : > { %1122 = vst.msk [vmem:[%s2447_s26 + $0x8] sm:$0xff] %vm1120_vm0, %v1114_v52  ;;  %v1101_v13 = vsel %vm1098_vm1, %v1980_v41, %v1061_v53 }
 0x2c6   : > { %v1108_v55 = vsel %vm999_vm2, %v1101_v13, %v1082_v54 }
 0x2c7   : > { %v1115_v56 = vmul.f32 %v1108_v55, %v2283_v17 }
 0x2c8   : > { %v1084_v57 = vpop.permute.xlu1 %1083  ;;  %v1063_v58 = vpop.permute.xlu0 %1062 }
 0x2c9   : > { %1123 = vst.msk [vmem:[%s2447_s26 + $0x10] sm:$0xff] %vm1120_vm0, %v1115_v56  ;;  %v1102_v59 = vsel %vm1098_vm1, %v1982_v42, %v1063_v58  ;;  %v837_v60 = vpop.f32.mrb[0].mxu1 }
 0x2ca   : > { %v1109_v15 = vsel %vm999_vm2, %v1102_v59, %v1084_v57  ;;  %v1725_v61 = vpop.f32.mrb[1].mxu1 }
 0x2cb   : > { %v1116_v62 = vmul.f32 %v1109_v15, %v2285_v19 }
 0x2cc   : > { %v1065_v63 = vpop.permute.xlu1 %1064  ;;  %v1086_v0 = vpop.permute.xlu0 %1085 }
 0x2cd   : > { %1124 = vst.msk [vmem:[%s2447_s26 + $0x18] sm:$0xff] %vm1120_vm0, %v1116_v62  ;;  %v1103_v1 = vsel %vm1098_vm1, %v1984_v23, %v1065_v63  ;;  %v842_v17 = vpop.f32.mrb[2].mxu1 }
 0x2ce   : > { %v1110_v2 = vsel %vm999_vm2, %v1103_v1, %v1086_v0  ;;  %v1728_v3 = vpop.f32.mrb[3].mxu1 }
 0x2cf   : > { %v1117_v5 = vmul.f32 %v1110_v2, %v2292_v22 }
 0x2d0   : > { %v1069_v6 = vpop.permute.xlu1 %1068  ;;  %v1067_v7 = vpop.permute.xlu0 %1066 }
 0x2d1   : > { %1125 = vst.msk [vmem:[%s2447_s26 + $0x20] sm:$0xff] %vm1120_vm0, %v1117_v5  ;;  %v847_v8 = vpop.f32.mrb[4].mxu1  ;;  %v1105_v9 = vsel %vm1098_vm1, %v1988_v43, %v1069_v6  ;;  %v1104_v10 = vsel %vm1098_vm1, %v1986_v26, %v1067_v7 }
 0x2d2   : > { %v1731_v19 = vpop.f32.mrb[5].mxu1 }
 0x2d4   : > { %v1088_v11 = vpop.permute.xlu1 %1087  ;;  %v1090_v12 = vpop.permute.xlu0 %1089 }
 0x2d5   : > { %v1111_v14 = vsel %vm999_vm2, %v1104_v10, %v1088_v11  ;;  %v1112_v16 = vsel %vm999_vm2, %v1105_v9, %v1090_v12  ;;  %v852_v18 = vpop.f32.mrb[6].mxu1 }
 0x2d6   : > { %v1118_v22 = vmul.f32 %v1111_v14, %v2300_v25  ;;  %v1119_v21 = vmul.f32 %v1112_v16, %v2308_v28  ;;  %v1734_v24 = vpop.f32.mrb[7].mxu1 }
 0x2d8   : > { %1126 = vst.msk [vmem:[%s2447_s26 + $0x28] sm:$0xff] %vm1120_vm0, %v1118_v22  ;;  %1127 = vst.msk [vmem:[%s2447_s26 + $0x30] sm:$0xff] %vm1120_vm0, %v1119_v21 }
 0x2d9   : > { %v822_v27 = vpop.f32.mrb[14].mxu0  ;;  %v944_v30 = vpop.f32.mrb[8].mxu1 }
 0x2da   : > { %v945_v34 = vadd.f32 %v944_v30, %v822_v27  ;;  %v1716_v31 = vpop.f32.mrb[15].mxu0  ;;  %v1741_v32 = vpop.f32.mrb[9].mxu1 }
 0x2dc   : > { %v985_v35 = vadd.f32 %v1626_v4, %v945_v34 }
 0x2dd   : > { %v827_v36 = vpop.f32.mrb[16].mxu0  ;;  %v949_v25 = vpop.f32.mrb[10].mxu1 }
 0x2de   : > { %v992_v37 = vmax.f32 %v985_v35, 0.0  ;;  %v950_v28 = vadd.f32 %v949_v25, %v827_v36  ;;  %v1719_v38 = vpop.f32.mrb[17].mxu0  ;;  %v1744_v33 = vpop.f32.mrb[11].mxu1 }
 0x2e0   : > { %1000 = vst.msk [vmem:[%s2485_s30] sm:$0xff] %vm999_vm2, %v992_v37  ;;  %v986_v20 = vadd.f32 %v1626_v4, %v950_v28 }
 0x2e1   : > { %v832_v39 = vpop.f32.mrb[18].mxu0  ;;  %v954_v40 = vpop.f32.mrb[12].mxu1 }
 0x2e2   : > { %v993_v41 = vmax.f32 %v986_v20, 0.0  ;;  %v955_v42 = vadd.f32 %v954_v40, %v832_v39  ;;  %v1722_v23 = vpop.f32.mrb[19].mxu0  ;;  %v1747_v26 = vpop.f32.mrb[13].mxu1 }
 0x2e4   : > { %1001 = vst.msk [vmem:[%s2485_s30 + $0x8] sm:$0xff] %vm999_vm2, %v993_v41  ;;  %v987_v43 = vadd.f32 %v1626_v4, %v955_v42 }
 0x2e5   : > { %v959_v44 = vpop.f32.mrb[14].mxu1 }
 0x2e6   : > { %v994_v45 = vmax.f32 %v987_v43, 0.0  ;;  %v960_v46 = vadd.f32 %v959_v44, %v837_v60  ;;  %v1750_v47 = vpop.f32.mrb[15].mxu1 }
 0x2e8   : > { %1002 = vst.msk [vmem:[%s2485_s30 + $0x10] sm:$0xff] %vm999_vm2, %v994_v45  ;;  %v988_v29 = vadd.f32 %v1626_v4, %v960_v46 }
 0x2e9   : > { %v964_v48 = vpop.f32.mrb[16].mxu1 }
 0x2ea   : > { %v995_v49 = vmax.f32 %v988_v29, 0.0  ;;  %v965_v50 = vadd.f32 %v964_v48, %v842_v17  ;;  %v1753_v51 = vpop.f32.mrb[17].mxu1 }
 0x2ec   : > { %1003 = vst.msk [vmem:[%s2485_s30 + $0x18] sm:$0xff] %vm999_vm2, %v995_v49  ;;  %v989_v52 = vadd.f32 %v1626_v4, %v965_v50 }
 0x2ed   : > { %v969_v53 = vpop.f32.mrb[18].mxu1 }
 0x2ee   : > { %v996_v54 = vmax.f32 %v989_v52, 0.0  ;;  %v970_v13 = vadd.f32 %v969_v53, %v847_v8  ;;  %v1756_v55 = vpop.f32.mrb[19].mxu1 }
 0x2f0   : > { %1004 = vst.msk [vmem:[%s2485_s30 + $0x20] sm:$0xff] %vm999_vm2, %v996_v54  ;;  %v990_v56 = vadd.f32 %v1626_v4, %v970_v13 }
 0x2f1   : > { %v974_v57 = vpop.f32.mrb[20].mxu1 }
 0x2f2   : > { %v997_v58 = vmax.f32 %v990_v56, 0.0  ;;  %v975_v59 = vadd.f32 %v974_v57, %v852_v18  ;;  %v1759_v60 = vpop.f32.mrb[21].mxu1  ;;  %1138 = sbr.rel (!%p2224_p4) target bundleno = 822 (0x336), region = 48 }
 0x2f4   : > { %1005 = vst.msk [vmem:[%s2485_s30 + $0x28] sm:$0xff] %vm999_vm2, %v997_v58  ;;  %v991_v15 = vadd.f32 %v1626_v4, %v975_v59 }
 0x2f6   : > { %v998_v61 = vmax.f32 %v991_v15, 0.0 }
 0x2f8   : > { %1006 = vst.msk [vmem:[%s2485_s30 + $0x30] sm:$0xff] %vm999_vm2, %v998_v61 }
 0x2f9   : > { %s2624_s10 = smov (!%p1141_p8, %s1140_s10), 7 }
 0x2fa   : > { %s1634_s16 = sshll.u32 %s2624_s10, 7 }
 0x2fb   : > { %p1637_p9 = scmp.eq.s32.totalorder %s1634_s16, 0 }
 0x2fc   : > { %1989 = sdivrem.u32 (!%p1637_p9), %s2624_s10, 7 }
 0x2fd   : > { %1149 = sbr.rel (%p1637_p9) target bundleno = 822 (0x336), region = 52 }
 0x305   : > { %s2514_s19 = spop.drf %1989 }
 0x306   : > { %p1638_p10 = scmp.le.s32.totalorder %s2514_s19, 0 }
 0x307   : > { %s2614_s20 = smov (!%p1638_p10), %s2508_s15  ;;  %s2615_s21 = smov (!%p1638_p10), %s2485_s30 }
 0x308   : > { %1512 = sbr.rel (%p1638_p10) target bundleno = 793 (0x319), region = 203  ;;  %s2523_s17 = smov (!%p1638_p10), 0  }
 0x309   : > { %s2525_s18 = smov (!%p1638_p10), 0  }
 0x30f LB: >> { %v1225_v62 = vld [vmem:[%s2091_s21] sm:$0xff]  ;;  %v1227_v63 = vld [vmem:[%s2091_s21 + $0x8] sm:$0xff]  ;;  %v1229_v0 = vld [vmem:[%s2091_s21 + $0x10] sm:$0xff]  ;;  %s1239_s22 = sadd.s32 1, %s2095_s17  ;;  %s1219_s18 = sadd.s32 1, %s2099_s18   ;;  %s2099_s18 = sphi %s2525_s18, %s1219_s18   ;;  %s2095_s17 = sphi %s2523_s17, %s2616_s17   ;;  %s2091_s21 = sphi %s2615_s21, %s1244_s21   ;;  %s2087_s20 = sphi %s2614_s20, %s1245_s20  }
 0x310   : >> { %1226 = vst [vmem:[%s2087_s20] sm:$0xff] %v1225_v62  ;;  %1228 = vst [vmem:[%s2087_s20 + $0x8] sm:$0xff] %v1227_v63  ;;  %v1231_v1 = vld [vmem:[%s2091_s21 + $0x18] sm:$0xff]  ;;  %v1233_v17 = vld [vmem:[%s2091_s21 + $0x20] sm:$0xff]  ;;  %p1240_p11 = scmp.ge.s32.totalorder %s1239_s22, %s2514_s19  ;;  %p1218_p12 = scmp.ge.s32.totalorder %s1219_s18, %s2514_s19 }
 0x311   : >> { %1230 = vst [vmem:[%s2087_s20 + $0x10] sm:$0xff] %v1229_v0  ;;  %v1235_v2 = vld [vmem:[%s2091_s21 + $0x28] sm:$0xff]  ;;  %1232 = vst [vmem:[%s2087_s20 + $0x18] sm:$0xff] %v1231_v1  ;;  %v1237_v3 = vld [vmem:[%s2091_s21 + $0x30] sm:$0xff] }
 0x312   : >> { %1234 = vst [vmem:[%s2087_s20 + $0x20] sm:$0xff] %v1233_v17  ;;  %1236 = vst [vmem:[%s2087_s20 + $0x28] sm:$0xff] %v1235_v2  ;;  %s2626_s22 = smov (%p1240_p11, %s1239_s22), 0  ;;  %1221 = sbr.rel (!%p1218_p12) target bundleno = 783 (0x30f), region = 209 }
 0x313   : >> { %1238 = vst [vmem:[%s2087_s20 + $0x30] sm:$0xff] %v1237_v3  ;;  %s1242_s23 = smul.u32 56, %s2626_s22  ;;  %s2616_s17 = smov %s2626_s22 }
 0x315   : >> { %s1244_s21 = scalar_lea.vmem %s2485_s30, %s1242_s23 [#allocation2]   ;;  %s1245_s20 = scalar_lea.vmem %s2508_s15, %s1242_s23  }
 0x319 PF: > { %1991 = sdivrem.u32 %s2624_s10, 7 }
 0x31a   : > { %s1639_s24 = smul.u32 56, %s2514_s19 }
 0x31c   : > { %s1250_s29 = scalar_lea.vmem %s2485_s30, %s1639_s24 [#allocation2]   ;;  %s1252_s11 = scalar_lea.vmem %s2508_s15, %s1639_s24  }
 0x322   : > { %s1992_s12 = spop.drf %1991 }
 0x323   : > { %p1641_p13 = scmp.le.s32.totalorder %s1992_s12, 0 }
 0x324   : > { %s2101_s13 = smov (!%p1641_p13), %s1252_s11   ;;  %s2105_s16 = smov (!%p1641_p13), %s1250_s29  }
 0x325   : > { %1526 = sbr.rel (%p1641_p13) target bundleno = 822 (0x336), region = 214  ;;  %s2109_s23 = smov (!%p1641_p13), 0  }
 0x326   : > { %s2113_s0 = smov (!%p1641_p13), 0  }
 0x32c LB: >> { %v1262_v5 = vld [vmem:[%s2107_s16] sm:$0xff]  ;;  %s1264_s20 = sadd.s32 1, %s2111_s23  ;;  %s1256_s0 = sadd.s32 1, %s2115_s0   ;;  %s2115_s0 = sphi %s2113_s0, %s1256_s0   ;;  %s2111_s23 = sphi %s2109_s23, %s2110_s23   ;;  %s2107_s16 = sphi %s2105_s16, %s1269_s16   ;;  %s2103_s13 = sphi %s2101_s13, %s1270_s13  }
 0x32d   : >> { %1263 = vst [vmem:[%s2103_s13] sm:$0xff] %v1262_v5  ;;  %p1265_p0 = scmp.ge.s32.totalorder %s1264_s20, %s1992_s12  ;;  %p1255_p1 = scmp.ge.s32.totalorder %s1256_s0, %s1992_s12 }
 0x32f   : >> { %s2628_s20 = smov (%p1265_p0, %s1264_s20), 0  ;;  %1258 = sbr.rel (!%p1255_p1) target bundleno = 812 (0x32c), region = 220 }
 0x330   : >> { %s1642_s30 = sshll.u32 %s2628_s20, 3  ;;  %s2110_s23 = smov %s2628_s20  }
 0x331   : >> { %s1269_s16 = scalar_lea.vmem %s1250_s29, %s1642_s30 [#allocation2]   ;;  %s1270_s13 = scalar_lea.vmem %s1252_s11, %s1642_s30  }
 0x336 PF: > { %1276 = sbr.rel (!%p2224_p4) target bundleno = 890 (0x37a), region = 100  ;;  %s1278_s10 = ssub.s32 (%p2224_p4), 13, %s2238_s14 }
 0x337   : > { %s1657_s15 = smul.u32 (%p2224_p4), 56, %s2212_s27  ;;  %p1279_p2 = scmp.lt.s32.totalorder (%p2224_p4), %s1278_s10, 7 }
 0x339   : > { %s2554_s17 = scalar_lea.vmem (%p2224_p4), %s2610_s7, %s1657_s15  }
 0x33d   : > { %s2630_s10 = smov (!%p1279_p2, %s1278_s10), 7 }
 0x33e   : > { %s1644_s0 = sshll.u32 %s2630_s10, 7 }
 0x33f   : > { %p1647_p3 = scmp.eq.s32.totalorder %s1644_s0, 0 }
 0x340   : > { %1993 = sdivrem.u32 (!%p1647_p3), %s2630_s10, 7 }
 0x341   : > { %1287 = sbr.rel (%p1647_p3) target bundleno = 890 (0x37a), region = 104 }
 0x349   : > { %s2560_s9 = spop.drf %1993 }
 0x34a   : > { %p1648_p4 = scmp.le.s32.totalorder %s2560_s9, 0 }
 0x34b   : > { %s2617_s27 = smov (!%p1648_p4), %s2554_s17  ;;  %s2618_s14 = smov (!%p1648_p4), %s2447_s26 }
 0x34c   : > { %1540 = sbr.rel (%p1648_p4) target bundleno = 861 (0x35d), region = 225  ;;  %s2569_s18 = smov (!%p1648_p4), 0  }
 0x34d   : > { %s2571_s22 = smov (!%p1648_p4), 0  }
 0x353 LB: >> { %v1363_v6 = vld [vmem:[%s2123_s14] sm:$0xff]  ;;  %v1365_v7 = vld [vmem:[%s2123_s14 + $0x8] sm:$0xff]  ;;  %v1367_v8 = vld [vmem:[%s2123_s14 + $0x10] sm:$0xff]  ;;  %s1377_s24 = sadd.s32 1, %s2127_s18  ;;  %s1357_s22 = sadd.s32 1, %s2131_s22   ;;  %s2131_s22 = sphi %s2571_s22, %s1357_s22   ;;  %s2127_s18 = sphi %s2569_s18, %s2619_s18   ;;  %s2123_s14 = sphi %s2618_s14, %s1382_s14   ;;  %s2119_s27 = sphi %s2617_s27, %s1383_s27  }
 0x354   : >> { %1364 = vst [vmem:[%s2119_s27] sm:$0xff] %v1363_v6  ;;  %1366 = vst [vmem:[%s2119_s27 + $0x8] sm:$0xff] %v1365_v7  ;;  %v1369_v19 = vld [vmem:[%s2123_s14 + $0x18] sm:$0xff]  ;;  %v1371_v9 = vld [vmem:[%s2123_s14 + $0x20] sm:$0xff]  ;;  %p1378_p5 = scmp.ge.s32.totalorder %s1377_s24, %s2560_s9  ;;  %p1356_p6 = scmp.ge.s32.totalorder %s1357_s22, %s2560_s9 }
 0x355   : >> { %1368 = vst [vmem:[%s2119_s27 + $0x10] sm:$0xff] %v1367_v8  ;;  %v1373_v10 = vld [vmem:[%s2123_s14 + $0x28] sm:$0xff]  ;;  %1370 = vst [vmem:[%s2119_s27 + $0x18] sm:$0xff] %v1369_v19  ;;  %v1375_v11 = vld [vmem:[%s2123_s14 + $0x30] sm:$0xff] }
 0x356   : >> { %1372 = vst [vmem:[%s2119_s27 + $0x20] sm:$0xff] %v1371_v9  ;;  %1374 = vst [vmem:[%s2119_s27 + $0x28] sm:$0xff] %v1373_v10  ;;  %s2632_s24 = smov (%p1378_p5, %s1377_s24), 0  ;;  %1359 = sbr.rel (!%p1356_p6) target bundleno = 851 (0x353), region = 231 }
 0x357   : >> { %1376 = vst [vmem:[%s2119_s27 + $0x30] sm:$0xff] %v1375_v11  ;;  %s1380_s29 = smul.u32 56, %s2632_s24  ;;  %s2619_s18 = smov %s2632_s24 }
 0x359   : >> { %s1382_s14 = scalar_lea.vmem %s2447_s26, %s1380_s29 [#allocation3]   ;;  %s1383_s27 = scalar_lea.vmem %s2554_s17, %s1380_s29  }
 0x35d PF: > { %1995 = sdivrem.u32 %s2630_s10, 7 }
 0x35e   : > { %s1649_s11 = smul.u32 56, %s2560_s9 }
 0x360   : > { %s1388_s12 = scalar_lea.vmem %s2447_s26, %s1649_s11 [#allocation3]   ;;  %s1390_s13 = scalar_lea.vmem %s2554_s17, %s1649_s11  }
 0x366   : > { %s1996_s16 = spop.drf %1995 }
 0x367   : > { %p1651_p7 = scmp.le.s32.totalorder %s1996_s16, 0 }
 0x368   : > { %s2133_s23 = smov (!%p1651_p7), %s1390_s13   ;;  %s2137_s20 = smov (!%p1651_p7), %s1388_s12  }
 0x369   : > { %1554 = sbr.rel (%p1651_p7) target bundleno = 890 (0x37a), region = 236  ;;  %s2141_s30 = smov (!%p1651_p7), 0  }
 0x36a   : > { %s2145_s15 = smov (!%p1651_p7), 0  }
 0x370 LB: >> { %v1400_v12 = vld [vmem:[%s2139_s20] sm:$0xff]  ;;  %s1402_s19 = sadd.s32 1, %s2143_s30  ;;  %s1394_s15 = sadd.s32 1, %s2147_s15   ;;  %s2147_s15 = sphi %s2145_s15, %s1394_s15   ;;  %s2143_s30 = sphi %s2141_s30, %s2142_s30   ;;  %s2139_s20 = sphi %s2137_s20, %s1407_s20   ;;  %s2135_s23 = sphi %s2133_s23, %s1408_s23  }
 0x371   : >> { %1401 = vst [vmem:[%s2135_s23] sm:$0xff] %v1400_v12  ;;  %p1403_p8 = scmp.ge.s32.totalorder %s1402_s19, %s1996_s16  ;;  %p1393_p9 = scmp.ge.s32.totalorder %s1394_s15, %s1996_s16 }
 0x373   : >> { %s2634_s19 = smov (%p1403_p8, %s1402_s19), 0  ;;  %1396 = sbr.rel (!%p1393_p9) target bundleno = 880 (0x370), region = 242 }
 0x374   : >> { %s1652_s26 = sshll.u32 %s2634_s19, 3  ;;  %s2142_s30 = smov %s2634_s19  }
 0x375   : >> { %s1407_s20 = scalar_lea.vmem %s1388_s12, %s1652_s26 [#allocation3]   ;;  %s1408_s23 = scalar_lea.vmem %s1390_s13, %s1652_s26  }
 0x37a PF: > { %p15_p10 = scmp.ge.s32.totalorder %s2214_s28, 4   ;;  %s2620_s24 = smov %s2079_s25 }
 0x37b   : > { %s2621_s25 = smov %s2222_s8  ;;  %s2622_s26 = smov %s2214_s28 }
 0x37c   :  { %17 = sbr.rel (!%p15_p10) target bundleno = 4 (0x4), region = 253 }

</bundles_post_ra>
